<compile_context>
chip_gen: v6e
topology: v6e:2x2x1
jax: 0.10.0
libtpu: 0.0.40
codegen_flags: <defaults>
</compile_context>

<pallas_src>
import jax
import jax.numpy as jnp
from jax import lax
from jax.experimental import pallas as pl
from jax.experimental.pallas import tpu as pltpu


def _fc_softmax_kernel(x_ref, w_ref, b_ref, o_ref):
    # x_ref: (TB, 784)  w_ref: (10, 784)  b_ref: (1, 10)  o_ref: (TB, 10)
    x = x_ref[...]
    w = w_ref[...]
    b = b_ref[...]

    # Linear layer on the MXU: contract the last (feature) axis of both operands
    # so K stays on lanes for both; weight stays in its lane-dense (10, 784) layout.
    logits = lax.dot_general(
        x, w, (((1,), (1,)), ((), ())),
        preferred_element_type=jnp.float32,
    ) + b                                                   # (TB, 10)

    # Numerically stable softmax over the last (feature) axis.
    m = jnp.max(logits, axis=-1, keepdims=True)
    e = jnp.exp(logits - m)
    denom = jnp.sum(e, axis=-1, keepdims=True)
    o_ref[...] = (e / denom).astype(o_ref.dtype)


def model1_forward(x, weight, bias, *, tb=512):
    """x: (B, 784); weight: (10, 784) (native PyTorch layout); bias: (10,)."""
    x = x.astype(jnp.float32)
    w = weight.astype(jnp.float32)          # cast once in the wrapper, not per tile
    B, F = x.shape
    N = w.shape[0]
    b2 = bias.astype(jnp.float32).reshape(1, N)

    if B <= tb:
        # Tiny-batch path: single block, no per-step overhead, no padding.
        TB = B
        Bp = B
    else:
        # Large-batch path: tile over batch for DMA/compute pipelining.
        TB = tb                              # multiple of 8; fits v5e 16 MiB scoped VMEM
        Bp = pl.cdiv(B, TB) * TB
        if Bp != B:
            x = jnp.pad(x, ((0, Bp - B), (0, 0)))

    grid = (Bp // TB,)

    cost = pl.CostEstimate(
        flops=2 * Bp * F * N,
        bytes_accessed=Bp * F * 4 + N * F * 4 + N * 4 + Bp * N * 4,
        transcendentals=Bp * N,
    )

    out = pl.pallas_call(
        _fc_softmax_kernel,
        out_shape=jax.ShapeDtypeStruct((Bp, N), jnp.float32),
        grid_spec=pltpu.PrefetchScalarGridSpec(
            num_scalar_prefetch=0,
            grid=grid,
            in_specs=[
                pl.BlockSpec((TB, F), lambda i: (i, 0)),   # streamed batch tiles
                pl.BlockSpec((N, F), lambda i: (0, 0)),    # weight resident across grid
                pl.BlockSpec((1, N), lambda i: (0, 0)),    # bias resident across grid
            ],
            out_specs=pl.BlockSpec((TB, N), lambda i: (i, 0)),
        ),
        compiler_params=pltpu.CompilerParams(
            dimension_semantics=("parallel",),   # batch axis is embarrassingly parallel (v7x megacore)
        ),
        cost_estimate=cost,
    )(x, w, b2)

    if Bp != B:
        out = out[:B]
    return out


if __name__ == "__main__":
    key = jax.random.PRNGKey(0)
    kx, kw, kb, kx2 = jax.random.split(key, 4)

    # Deterministic parameter init mimicking nn.Linear defaults (uniform(-k, k), k=1/sqrt(784))
    k = 1.0 / jnp.sqrt(784.0)
    weight = jax.random.uniform(kw, (10, 784), minval=-k, maxval=k, dtype=jnp.float32)
    bias = jax.random.uniform(kb, (10,), minval=-k, maxval=k, dtype=jnp.float32)

    def ref_fn(xx):
        return jax.nn.softmax(xx @ weight.T + bias, axis=-1)

    # --- small-batch path (single block) ---
    B = 8
    x = jax.random.normal(kx, (B, 784), dtype=jnp.float32)
    out = jax.block_until_ready(model1_forward(x, weight, bias))
    ref = ref_fn(x)
    assert out.shape == (B, 10)
    assert jnp.allclose(out, ref, atol=1e-5), "small-batch mismatch vs reference"
    assert jnp.allclose(jnp.sum(out, axis=-1), 1.0, atol=1e-5)

    # --- tiled path (grid over batch, includes a partial final tile) ---
    B2 = 1040
    x2 = jax.random.normal(kx2, (B2, 784), dtype=jnp.float32)
    out2 = jax.block_until_ready(model1_forward(x2, weight, bias))
    ref2 = ref_fn(x2)
    assert out2.shape == (B2, 10)
    assert jnp.allclose(out2, ref2, atol=1e-5), "tiled-batch mismatch vs reference"
    assert jnp.allclose(jnp.sum(out2, axis=-1), 1.0, atol=1e-5)

    print("KERNEL_OK")
</pallas_src>

<mosaic_0001>
module attributes {stable_mosaic.version = 11 : i64} {
  func.func @_fc_softmax_kernel(%arg0: i32, %arg1: memref<8x784xf32, #tpu.memory_space<vmem>>, %arg2: memref<10x784xf32, #tpu.memory_space<vmem>>, %arg3: memref<1x10xf32, #tpu.memory_space<vmem>>, %arg4: memref<8x10xf32, #tpu.memory_space<vmem>>) attributes {dimension_semantics = [#tpu.dimension_semantics<parallel>], iteration_bounds = array<i64: 1>, scalar_prefetch = 0 : i64, scratch_operands = 0 : i64, tpu.core_type = #tpu.core_type<tc>, window_params = [{transform_indices = @transform_0, window_bounds = array<i64: 8, 784>}, {pipeline_mode = #tpu.pipeline_mode<synchronous>, transform_indices = @transform_1, window_bounds = array<i64: 10, 784>}, {pipeline_mode = #tpu.pipeline_mode<synchronous>, transform_indices = @transform_2, window_bounds = array<i64: 1, 10>}, {transform_indices = @transform_3, window_bounds = array<i64: 8, 10>}]} {
    %c0 = arith.constant 0 : index
    %c0_0 = arith.constant 0 : index
    %0 = vector.load %arg1[%c0, %c0_0] : memref<8x784xf32, #tpu.memory_space<vmem>>, vector<8x784xf32>
    %c0_1 = arith.constant 0 : index
    %c0_2 = arith.constant 0 : index
    %1 = vector.load %arg2[%c0_1, %c0_2] : memref<10x784xf32, #tpu.memory_space<vmem>>, vector<10x784xf32>
    %c0_3 = arith.constant 0 : index
    %c0_4 = arith.constant 0 : index
    %2 = vector.load %arg3[%c0_3, %c0_4] : memref<1x10xf32, #tpu.memory_space<vmem>>, vector<1x10xf32>
    %cst = arith.constant dense<0.000000e+00> : vector<8x10xf32>
    %3 = tpu.matmul %0, %1, %cst {dimension_numbers = #tpu.dot_dimension_numbers<[1], [1], [0], [0], [0, 0, 1, 0], [], []>} : vector<8x784xf32>, vector<10x784xf32>, vector<8x10xf32> -> vector<8x10xf32>
    %4 = vector.broadcast %2 : vector<1x10xf32> to vector<8x10xf32>
    %5 = arith.addf %3, %4 : vector<8x10xf32>
    %cst_5 = arith.constant dense<0xFF800000> : vector<8xf32>
    %6 = vector.multi_reduction <maximumf>, %5, %cst_5 [1] : vector<8x10xf32> to vector<8xf32>
    %7 = vector.shape_cast %6 : vector<8xf32> to vector<8x1xf32>
    %8 = vector.broadcast %7 : vector<8x1xf32> to vector<8x10xf32>
    %9 = arith.subf %5, %8 : vector<8x10xf32>
    %10 = math.exp %9 : vector<8x10xf32>
    %cst_6 = arith.constant dense<0.000000e+00> : vector<8xf32>
    %11 = vector.multi_reduction <add>, %10, %cst_6 [1] : vector<8x10xf32> to vector<8xf32>
    %12 = vector.shape_cast %11 : vector<8xf32> to vector<8x1xf32>
    %13 = vector.broadcast %12 : vector<8x1xf32> to vector<8x10xf32>
    %14 = arith.divf %10, %13 : vector<8x10xf32>
    %c0_7 = arith.constant 0 : index
    %c0_8 = arith.constant 0 : index
    %15 = vector.load %arg4[%c0_7, %c0_8] : memref<8x10xf32, #tpu.memory_space<vmem>>, vector<8x10xf32>
    tpu.vector_store %arg4[%c0_7, %c0_8], %14 {strides = array<i32>} : memref<8x10xf32, #tpu.memory_space<vmem>>, vector<8x10xf32>,
    return
  }
  func.func @transform_0(%arg0: i32) -> (i32, i32) {
    %c0_i32 = arith.constant 0 : i32
    %c0_i32_0 = arith.constant 0 : i32
    return %arg0, %c0_i32 : i32, i32
  }
  func.func @transform_1(%arg0: i32) -> (i32, i32) {
    %c0_i32 = arith.constant 0 : i32
    %c0_i32_0 = arith.constant 0 : i32
    %c0_i32_1 = arith.constant 0 : i32
    return %c0_i32, %c0_i32_0 : i32, i32
  }
  func.func @transform_2(%arg0: i32) -> (i32, i32) {
    %c0_i32 = arith.constant 0 : i32
    %c0_i32_0 = arith.constant 0 : i32
    %c0_i32_1 = arith.constant 0 : i32
    return %c0_i32, %c0_i32_0 : i32, i32
  }
  func.func @transform_3(%arg0: i32) -> (i32, i32) {
    %c0_i32 = arith.constant 0 : i32
    %c0_i32_0 = arith.constant 0 : i32
    return %arg0, %c0_i32 : i32, i32
  }
}

</mosaic_0001>

<bundles_post_ra>
// kernel: tpu_custom_call.1
= control target key start
LH: loop header
LB: loop body
LE: loop exit
PB: predicated region body
PF: predicated region fallthrough
CT: control target
= control target key end

     0   :  { %8 = vsyncpa [#allocation3], 0  ;;  %s524_s0 = inlined_call_operand.hbm [shape: f32[8,784], index: 0, kind: input, shape index: {}]   ;;  %s525_s1 = inlined_call_operand.hbm [shape: f32[10,784], index: 1, kind: input, shape index: {}]   ;;  %s526_s2 = inlined_call_operand.vmem [shape: f32[1,10], index: 2, kind: input, shape index: {}]   ;;  %s527_s3 = inlined_call_operand.hbm [shape: f32[8,10], index: 3, kind: output, shape index: {}]  }
   0x1   :  { %9 = vsyncpa [#allocation6], 0 }
   0x2   :  { %10 = vsyncpa [#allocation4], 0  ;;  %s479_s12 = smov [#allocation2]   ;;  %s480_s14 = smov [#allocation5]  }
   0x3   :  { %s17_s13 = sshll.u32 %s479_s12, 4  ;;  %s26_s15 = sshll.u32 %s480_s14, 4  ;;  %s18_s13 = int_to_ptr.vmem [resolvable:$true] %s17_s13  ;;  %s27_s15 = int_to_ptr.vmem [resolvable:$true] %s26_s15 }
   0x4   :  { %s421_s16 = scalar_lea.vmem %s18_s13, 896  ;;  %p426_p1 = scmp.lt.s32.totalorder %s18_s13, %s18_s13 }
   0x5   :  { %p422_p0 = scmp.ne.s32.totalorder %s18_s13, %s421_s16  ;;  %p427_p2 = scmp.lt.s32.totalorder %s421_s16, %s421_s16 }
   0x7   :  { %p428_p3 = por %p427_p2, %p426_p1 }
   0x9   :  { %p429_p4 = pnand %p428_p3, %p422_p0 }
   0xb   :  { %432 = shalt.err (!%p429_p4)
}
   0xc   :  { %20 = dma.hbm_to_vmem [thread:$0]  %s524_s0, 896, %s18_s13, [#allocation3]  }
   0xd   :  { %s441_s19 = scalar_lea.vmem %s27_s15, 1792  ;;  %p446_p6 = scmp.lt.s32.totalorder %s27_s15, %s27_s15 }
   0xe   :  { %p442_p5 = scmp.ne.s32.totalorder %s27_s15, %s441_s19  ;;  %p447_p7 = scmp.lt.s32.totalorder %s441_s19, %s441_s19 }
  0x10   :  { %p448_p8 = por %p447_p7, %p446_p6 }
  0x12   :  { %p449_p9 = pnand %p448_p8, %p442_p5 }
  0x14   :  { %452 = shalt.err (!%p449_p9)
}
  0x15   :  { %s481_s20 = smov 896   ;;  %s482_s21 = smov 56  }
  0x16   :  { %32 = dma.hbm_to_vmem [thread:$0]  %s525_s1, 1792, %s27_s15, [#allocation6], %s481_s20, %s481_s20, %s482_s21  }
  0x17   :  { %473 = dma.done.wait [#allocation3], 896  }
  0x18   :  { %474 = vsyncadd [#allocation3], 4294966400 }
  0x19   :  { %475 = dma.done.wait [#allocation6], 1792  }
  0x1a   :  { %476 = vsyncadd [#allocation6], 4294965504  ;;  %v56_v0 = vld [vmem:[#allocation5 + $0x40] sm:$0x3]  ;;  %v58_v1 = vld [vmem:[#allocation5 + $0x50] sm:$0x3] }
  0x1b   :  { %v55_v2 = vld [vmem:[#allocation5 + $0x38] sm:$0x3]  ;;  %107 = vmatprep.subr.mxu0 %v56_v0  ;;  %177 = vmatprep.subr.mxu1 %v58_v1  ;;  %v57_v3 = vld [vmem:[#allocation5 + $0x48] sm:$0x3]  ;;  %v42_v6 = vld [vmem:[#allocation2 + $0x8] sm:$0xff]  ;;  %v483_v13 = vmov 0.0  }
  0x1c   :  { %v49_v4 = vld [vmem:[#allocation5 + $0x8] sm:$0xff]  ;;  %v51_v5 = vld [vmem:[#allocation5 + $0x18] sm:$0xff]  ;;  %108 = vmatpush1.xpose.msra.mxu0 %v55_v2  ;;  %178 = vmatpush1.xpose.msra.mxu1 %v57_v3  ;;  %v48_v7 = vld [vmem:[#allocation5] sm:$0xff]  ;;  %vm69_vm0 = vcmask 130048   ;;  %vm484_vm1 = vmmov 0   ;;  %vm359_vm2 = vcmask 80896  }
  0x1d   :  { %109 = vmatprep.subr.mxu0 %v49_v4  ;;  %179 = vmatprep.subr.mxu1 %v51_v5  ;;  %v50_v8 = vld [vmem:[#allocation5 + $0x10] sm:$0xff]  ;;  %v44_v9 = vld [vmem:[#allocation2 + $0x18] sm:$0xff]  ;;  %v41_v11 = vld [vmem:[#allocation2] sm:$0xff] }
  0x1e   :  { %143 = vmatprep.mubr.f32.mxu0 %v42_v6  ;;  %213 = vmatprep.mubr.f32.mxu1 %v44_v9  ;;  %v60_v10 = vld [vmem:[#allocation5 + $0x60] sm:$0x3]  ;;  %v43_v12 = vld [vmem:[#allocation2 + $0x10] sm:$0xff]  ;;  %v61_v15 = vld [vmem:[#allocation5 + $0x68] sm:$0x3] }
  0x1f   :  { %v59_v14 = vld [vmem:[#allocation5 + $0x58] sm:$0x3]  ;;  %v53_v16 = vld [vmem:[#allocation5 + $0x28] sm:$0xff]  ;;  %v46_v17 = vld [vmem:[#allocation2 + $0x28] sm:$0xff] }
  0x20   :  { %110 = vmatpush1.xpose.msra.mxu0 %v48_v7  ;;  %180 = vmatpush1.xpose.msra.mxu1 %v50_v8  ;;  %v52_v18 = vld [vmem:[#allocation5 + $0x20] sm:$0xff]  ;;  %v54_v19 = vld [vmem:[#allocation5 + $0x30] sm:$0xff]  ;;  %v45_v20 = vld [vmem:[#allocation2 + $0x20] sm:$0xff] }
  0x21   :  { %247 = vmatprep.subr.mxu0 %v60_v10  ;;  %395 = vmatprep.subr.mxu1 %v483_v13  ;;  %v47_v21 = vld [vmem:[#allocation2 + $0x30] sm:$0xff]  ;;  %v388_v22 = vld [vmem:[%s526_s2] ss:$0 sm:$0xff]  ;;  %s485_s2 = smov [#allocation7]  }
  0x22   :  { %s378_s24 = sshll.u32 %s485_s2, 4  ;;  %s379_s24 = int_to_ptr.vmem [resolvable:$true] %s378_s24 }
  0x23   :  { %144 = vmatmul.mubr.f32.vlgmr.msra.gmra.mxu0 %v41_v11  ;;  %214 = vmatmul.mubr.f32.vlgmr.msra.gmra.mxu1 %v43_v12  ;;  %s453_s25 = scalar_lea.vmem %s379_s24, 128  ;;  %p458_p11 = scmp.lt.s32.totalorder %s379_s24, %s379_s24 }
  0x24   :  { %248 = vmatpush1.xpose.msra.mxu0 %v59_v14  ;;  %396 = vmatpush3.xpose.msk.msra.mxu1 %vm69_vm0, %v61_v15  ;;  %p454_p10 = scmp.ne.s32.totalorder %s379_s24, %s453_s25  ;;  %p459_p12 = scmp.lt.s32.totalorder %s453_s25, %s453_s25 }
  0x25   :  { %249 = vmatprep.subr.mxu0 %v53_v16  ;;  %397 = vmatprep.subr.mxu1 %v483_v13 }
  0x26   :  { %283 = vmatprep.mubr.f32.mxu0 %v46_v17  ;;  %399 = vmatprep.mubr.msk.f32.mxu1 %vm484_vm1, %v483_v13  ;;  %p460_p13 = por %p459_p12, %p458_p11 }
  0x28   :  { %250 = vmatpush1.xpose.msra.mxu0 %v52_v18  ;;  %398 = vmatpush3.xpose.msk.msra.mxu1 %vm69_vm0, %v54_v19  ;;  %p461_p0 = pnand %p460_p13, %p454_p10 }
  0x2b   :  { %284 = vmatmul.mubr.f32.vlgmr.msra.gmra.mxu0 %v45_v20  ;;  %400 = vmatmul.mubr.msk.f32.vlgmr.msra.gmra.mxu1 %vm69_vm0, %v47_v21 }
  0xe3   :  { %v145_v23 = vpop.f32.mrf.mxu0  ;;  %v215_v24 = vpop.f32.mrf.mxu1 }
  0xe4   :  { %v146_v27 = vadd.f32 %v388_v22, %v145_v23 }
  0xe5   :  { %v147_v25 = vpop.f32.mrf.mxu0  ;;  %v217_v26 = vpop.f32.mrf.mxu1 }
  0xe6   :  { %v216_v28 = vadd.f32 %v215_v24, %v146_v27 }
  0xeb   :  { %v285_v29 = vpop.f32.mrf.mxu0  ;;  %v355_v30 = vpop.f32.mrf.mxu1 }
  0xec   :  { %v286_v31 = vadd.f32 %v285_v29, %v216_v28 }
  0xed   :  { %v287_v32 = vpop.f32.mrf.mxu0  ;;  %v401_v33 = vpop.f32.mrf.mxu1 }
  0xee   :  { %v356_v34 = vadd.f32 %v355_v30, %v286_v31 }
  0xf0   :  { %v360_v35 = vsel %vm359_vm2, %v356_v34, -inf }
  0xf1   :  { %361 = vmax.xlane.f32.xlu0 %v360_v35 }
 0x17a   :  { %v362_v36 = vpop.xlane.xlu0 %361 }
 0x17b   :  { %v363_v37 = vsub.f32 %v356_v34, %v362_v36 }
 0x17d   :  { %v364_v38 = vmul.f32 1.442695, %v363_v37 }
 0x17f   :  { %409 = vpow2.f32 %v364_v38 }
 0x18c   :  { %v410_v39 = vpop.eup %409 }
 0x18d   :  { %v366_v40 = vsel %vm359_vm2, %v410_v39, 0.0 }
 0x18e   :  { %367 = vadd.xlane.f32.xlu0 %v366_v40 }
 0x217   :  { %v368_v41 = vpop.xlane.xlu0 %367 }
 0x218   :  { %411 = vrcp.f32 %v368_v41 }
 0x225   :  { %v412_v42 = vpop.eup %411 }
 0x226   :  { %v370_v43 = vmul.f32 %v412_v42, %v410_v39 }
 0x228   :  { %371 = vst.msk [vmem:[#allocation7] sm:$0xff] %vm359_vm2, %v370_v43 }
 0x229   :  { %464 = shalt.err (!%p461_p0)
}
 0x22a   :  { %381 = dma.vmem_to_hbm [thread:$0]  %s379_s24, 128, %s527_s3, [#allocation4]  }
 0x22b   :  { %477 = dma.done.wait [#allocation4], 128  }
 0x22c   :  { %478 = vsyncadd [#allocation4], 4294967168 }
 0x22d   :  { %385 = vsyncpa [#allocation3], 1 }
 0x22e   :  { %386 = vsyncpa [#allocation6], 1 }
 0x22f   :  { %387 = vsyncpa [#allocation4], 1 }

</bundles_post_ra>
